<compile_context>
chip_gen: v6e
topology: v6e:2x2x1
jax: 0.10.0
libtpu: 0.0.40
codegen_flags: <defaults>
</compile_context>

<pallas_src>
import functools

import jax
import jax.numpy as jnp
from jax.experimental import pallas as pl
from jax.experimental.pallas import tpu as pltpu


def dqn_kernel(x_ref, w1_ref, b1_ref, w2_ref, b2_ref, w3_ref, b3_ref, o_ref):
    # x_ref: (4, TILE_B) -- batch on lanes; weights (out, in); biases (out, 1).
    x = x_ref[...]
    h1 = jnp.dot(w1_ref[...], x, preferred_element_type=jnp.float32)    # (16, TILE_B)
    h1 = jnp.maximum(h1 + b1_ref[...], 0.0)
    h2 = jnp.dot(w2_ref[...], h1, preferred_element_type=jnp.float32)   # (16, TILE_B)
    h2 = jnp.maximum(h2 + b2_ref[...], 0.0)
    out = jnp.dot(w3_ref[...], h2, preferred_element_type=jnp.float32)  # (2, TILE_B)
    o_ref[...] = (out + b3_ref[...]).astype(o_ref.dtype)


def _pick_tile(batch, max_tile_b):
    # Smallest multiple of 128 covering the batch, capped at max_tile_b.
    return min(pl.cdiv(batch, 128) * 128, max_tile_b)


@functools.partial(jax.jit, static_argnames=("max_tile_b",))
def mydqn_forward(x, params, *, max_tile_b=2048):
    """x: (B, 4) float32.  params: (w1, b1, w2, b2, w3, b3) with weights stored
    as (out_features, in_features) and biases as (out_features, 1).
    Returns (B, 2) float32 -- identical semantics to the PyTorch forward."""
    w1, b1, w2, b2, w3, b3 = params
    B, F = x.shape
    assert F == 4 and max_tile_b % 128 == 0

    tile_b = _pick_tile(B, max_tile_b)
    b_pad = pl.cdiv(B, tile_b) * tile_b

    # Batch-on-lanes: (4, B_pad), zero-padded so the lane axis tiles evenly.
    # Padded columns are computed and sliced away (mem-bound; waste is tiny).
    xt = jnp.zeros((F, b_pad), x.dtype).at[:, :B].set(x.T)

    # Weights/biases: full-array blocks with a constant block index -> DMA'd
    # once, resident in VMEM for the whole grid.
    def resident(arr):
        return pl.BlockSpec(arr.shape, lambda i: (0, 0))

    out_t = pl.pallas_call(
        dqn_kernel,
        out_shape=jax.ShapeDtypeStruct((2, b_pad), jnp.float32),
        grid=(b_pad // tile_b,),
        in_specs=[
            pl.BlockSpec((F, tile_b), lambda i: (0, i)),   # x batch tile
            resident(w1), resident(b1),
            resident(w2), resident(b2),
            resident(w3), resident(b3),
        ],
        out_specs=pl.BlockSpec((2, tile_b), lambda i: (0, i)),
        compiler_params=pltpu.CompilerParams(
            dimension_semantics=("parallel",)),
    )(xt, w1, b1, w2, b2, w3, b3)

    return out_t[:, :B].T


def init_params(key):
    """Mirror the PyTorch module: weights ~ Normal(0, 0.1); biases use the
    nn.Linear default Uniform(-1/sqrt(fan_in), 1/sqrt(fan_in)).
    Weights stored (out, in); biases stored (out, 1)."""
    k = jax.random.split(key, 6)
    w1 = 0.1 * jax.random.normal(k[0], (16, 4), jnp.float32)
    w2 = 0.1 * jax.random.normal(k[1], (16, 16), jnp.float32)
    w3 = 0.1 * jax.random.normal(k[2], (2, 16), jnp.float32)
    b1 = jax.random.uniform(k[3], (16, 1), jnp.float32,
                            minval=-1.0 / jnp.sqrt(4.0), maxval=1.0 / jnp.sqrt(4.0))
    b2 = jax.random.uniform(k[4], (16, 1), jnp.float32,
                            minval=-1.0 / jnp.sqrt(16.0), maxval=1.0 / jnp.sqrt(16.0))
    b3 = jax.random.uniform(k[5], (2, 1), jnp.float32,
                            minval=-1.0 / jnp.sqrt(16.0), maxval=1.0 / jnp.sqrt(16.0))
    return (w1, b1, w2, b2, w3, b3)


def _reference(x, params):
    w1, b1, w2, b2, w3, b3 = params
    h = jnp.maximum(x @ w1.T + b1.T, 0.0)
    h = jnp.maximum(h @ w2.T + b2.T, 0.0)
    return h @ w3.T + b3.T


if __name__ == "__main__":
    key = jax.random.PRNGKey(0)
    pkey, xkey1, xkey2 = jax.random.split(key, 3)
    params = init_params(pkey)

    # Case 1: tiny CartPole-style batch -> single 128-wide tile, one grid step.
    B1 = 8
    x1 = jax.random.normal(xkey1, (B1, 4), jnp.float32)
    out1 = mydqn_forward(x1, params)
    jax.block_until_ready(out1)
    ref1 = _reference(x1, params)
    assert out1.shape == (B1, 2)
    assert jnp.allclose(out1, ref1, atol=1e-5), "mismatch vs reference (B=8)"

    # Case 2: force multiple grid steps + padding of the last tile.
    B2 = 300
    x2 = jax.random.normal(xkey2, (B2, 4), jnp.float32)
    out2 = mydqn_forward(x2, params, max_tile_b=128)   # tile 128 -> grid of 3
    jax.block_until_ready(out2)
    ref2 = _reference(x2, params)
    assert out2.shape == (B2, 2)
    assert jnp.allclose(out2, ref2, atol=1e-5), "mismatch vs reference (B=300)"

    # Case 3: adaptive tile on the same batch (single step, tile 384).
    out3 = mydqn_forward(x2, params)
    jax.block_until_ready(out3)
    assert jnp.allclose(out3, ref2, atol=1e-5), "mismatch vs reference (adaptive tile)"

    print("KERNEL_OK")
</pallas_src>

<mosaic_0001>
module attributes {stable_mosaic.version = 11 : i64} {
  func.func @dqn_kernel(%arg0: i32, %arg1: memref<4x128xf32, #tpu.memory_space<vmem>>, %arg2: memref<16x4xf32, #tpu.memory_space<vmem>>, %arg3: memref<16x1xf32, #tpu.memory_space<vmem>>, %arg4: memref<16x16xf32, #tpu.memory_space<vmem>>, %arg5: memref<16x1xf32, #tpu.memory_space<vmem>>, %arg6: memref<2x16xf32, #tpu.memory_space<vmem>>, %arg7: memref<2x1xf32, #tpu.memory_space<vmem>>, %arg8: memref<2x128xf32, #tpu.memory_space<vmem>>) attributes {dimension_semantics = [#tpu.dimension_semantics<parallel>], iteration_bounds = array<i64: 1>, scalar_prefetch = 0 : i64, scratch_operands = 0 : i64, tpu.core_type = #tpu.core_type<tc>, window_params = [{transform_indices = @transform_0, window_bounds = array<i64: 4, 128>}, {pipeline_mode = #tpu.pipeline_mode<synchronous>, transform_indices = @transform_1, window_bounds = array<i64: 16, 4>}, {pipeline_mode = #tpu.pipeline_mode<synchronous>, transform_indices = @transform_2, window_bounds = array<i64: 16, 1>}, {pipeline_mode = #tpu.pipeline_mode<synchronous>, transform_indices = @transform_3, window_bounds = array<i64: 16, 16>}, {pipeline_mode = #tpu.pipeline_mode<synchronous>, transform_indices = @transform_4, window_bounds = array<i64: 16, 1>}, {pipeline_mode = #tpu.pipeline_mode<synchronous>, transform_indices = @transform_5, window_bounds = array<i64: 2, 16>}, {pipeline_mode = #tpu.pipeline_mode<synchronous>, transform_indices = @transform_6, window_bounds = array<i64: 2, 1>}, {transform_indices = @transform_7, window_bounds = array<i64: 2, 128>}]} {
    %c0 = arith.constant 0 : index
    %c0_0 = arith.constant 0 : index
    %0 = vector.load %arg1[%c0, %c0_0] : memref<4x128xf32, #tpu.memory_space<vmem>>, vector<4x128xf32>
    %c0_1 = arith.constant 0 : index
    %c0_2 = arith.constant 0 : index
    %1 = vector.load %arg2[%c0_1, %c0_2] : memref<16x4xf32, #tpu.memory_space<vmem>>, vector<16x4xf32>
    %cst = arith.constant dense<0.000000e+00> : vector<16x128xf32>
    %2 = tpu.matmul %1, %0, %cst {dimension_numbers = #tpu.dot_dimension_numbers<[1], [0], [0], [1], [0, 0, 1, 1], [], []>} : vector<16x4xf32>, vector<4x128xf32>, vector<16x128xf32> -> vector<16x128xf32>
    %c0_3 = arith.constant 0 : index
    %c0_4 = arith.constant 0 : index
    %3 = vector.load %arg3[%c0_3, %c0_4] : memref<16x1xf32, #tpu.memory_space<vmem>>, vector<16x1xf32>
    %4 = vector.broadcast %3 : vector<16x1xf32> to vector<16x128xf32>
    %5 = arith.addf %2, %4 : vector<16x128xf32>
    %cst_5 = arith.constant 0.000000e+00 : f32
    %6 = vector.broadcast %cst_5 : f32 to vector<16x128xf32>
    %7 = arith.maximumf %5, %6 : vector<16x128xf32>
    %c0_6 = arith.constant 0 : index
    %c0_7 = arith.constant 0 : index
    %8 = vector.load %arg4[%c0_6, %c0_7] : memref<16x16xf32, #tpu.memory_space<vmem>>, vector<16x16xf32>
    %cst_8 = arith.constant dense<0.000000e+00> : vector<16x128xf32>
    %9 = tpu.matmul %8, %7, %cst_8 {dimension_numbers = #tpu.dot_dimension_numbers<[1], [0], [0], [1], [0, 0, 1, 1], [], []>} : vector<16x16xf32>, vector<16x128xf32>, vector<16x128xf32> -> vector<16x128xf32>
    %c0_9 = arith.constant 0 : index
    %c0_10 = arith.constant 0 : index
    %10 = vector.load %arg5[%c0_9, %c0_10] : memref<16x1xf32, #tpu.memory_space<vmem>>, vector<16x1xf32>
    %11 = vector.broadcast %10 : vector<16x1xf32> to vector<16x128xf32>
    %12 = arith.addf %9, %11 : vector<16x128xf32>
    %cst_11 = arith.constant 0.000000e+00 : f32
    %13 = vector.broadcast %cst_11 : f32 to vector<16x128xf32>
    %14 = arith.maximumf %12, %13 : vector<16x128xf32>
    %c0_12 = arith.constant 0 : index
    %c0_13 = arith.constant 0 : index
    %15 = vector.load %arg6[%c0_12, %c0_13] : memref<2x16xf32, #tpu.memory_space<vmem>>, vector<2x16xf32>
    %cst_14 = arith.constant dense<0.000000e+00> : vector<2x128xf32>
    %16 = tpu.matmul %15, %14, %cst_14 {dimension_numbers = #tpu.dot_dimension_numbers<[1], [0], [0], [1], [0, 0, 1, 1], [], []>} : vector<2x16xf32>, vector<16x128xf32>, vector<2x128xf32> -> vector<2x128xf32>
    %c0_15 = arith.constant 0 : index
    %c0_16 = arith.constant 0 : index
    %17 = vector.load %arg7[%c0_15, %c0_16] : memref<2x1xf32, #tpu.memory_space<vmem>>, vector<2x1xf32>
    %18 = vector.broadcast %17 : vector<2x1xf32> to vector<2x128xf32>
    %19 = arith.addf %16, %18 : vector<2x128xf32>
    %c0_17 = arith.constant 0 : index
    %c0_18 = arith.constant 0 : index
    %20 = vector.load %arg8[%c0_17, %c0_18] : memref<2x128xf32, #tpu.memory_space<vmem>>, vector<2x128xf32>
    tpu.vector_store %arg8[%c0_17, %c0_18], %19 {strides = array<i32>} : memref<2x128xf32, #tpu.memory_space<vmem>>, vector<2x128xf32>,
    return
  }
  func.func @transform_0(%arg0: i32) -> (i32, i32) {
    %c0_i32 = arith.constant 0 : i32
    %c0_i32_0 = arith.constant 0 : i32
    return %c0_i32, %arg0 : i32, i32
  }
  func.func @transform_1(%arg0: i32) -> (i32, i32) {
    %c0_i32 = arith.constant 0 : i32
    %c0_i32_0 = arith.constant 0 : i32
    %c0_i32_1 = arith.constant 0 : i32
    return %c0_i32, %c0_i32_0 : i32, i32
  }
  func.func @transform_2(%arg0: i32) -> (i32, i32) {
    %c0_i32 = arith.constant 0 : i32
    %c0_i32_0 = arith.constant 0 : i32
    %c0_i32_1 = arith.constant 0 : i32
    return %c0_i32, %c0_i32_0 : i32, i32
  }
  func.func @transform_3(%arg0: i32) -> (i32, i32) {
    %c0_i32 = arith.constant 0 : i32
    %c0_i32_0 = arith.constant 0 : i32
    %c0_i32_1 = arith.constant 0 : i32
    return %c0_i32, %c0_i32_0 : i32, i32
  }
  func.func @transform_4(%arg0: i32) -> (i32, i32) {
    %c0_i32 = arith.constant 0 : i32
    %c0_i32_0 = arith.constant 0 : i32
    %c0_i32_1 = arith.constant 0 : i32
    return %c0_i32, %c0_i32_0 : i32, i32
  }
  func.func @transform_5(%arg0: i32) -> (i32, i32) {
    %c0_i32 = arith.constant 0 : i32
    %c0_i32_0 = arith.constant 0 : i32
    %c0_i32_1 = arith.constant 0 : i32
    return %c0_i32, %c0_i32_0 : i32, i32
  }
  func.func @transform_6(%arg0: i32) -> (i32, i32) {
    %c0_i32 = arith.constant 0 : i32
    %c0_i32_0 = arith.constant 0 : i32
    %c0_i32_1 = arith.constant 0 : i32
    return %c0_i32, %c0_i32_0 : i32, i32
  }
  func.func @transform_7(%arg0: i32) -> (i32, i32) {
    %c0_i32 = arith.constant 0 : i32
    %c0_i32_0 = arith.constant 0 : i32
    return %c0_i32, %arg0 : i32, i32
  }
}

</mosaic_0001>

<bundles_post_ra>
// kernel: mydqn_forward.1
= control target key start
LH: loop header
LB: loop body
LE: loop exit
PB: predicated region body
PF: predicated region fallthrough
CT: control target
= control target key end

     0   :  { %vm48_vm0 = vcmask 1043456   ;;  %vm41_vm1 = vcmask 31744   ;;  %v352_v3 = vmov 0   ;;  %vm143_vm2 = vcmask 130048   ;;  %s434_s0 = inlined_call_operand.vmem [shape: f32[4,128], index: 0, kind: input, shape index: {}]   ;;  %s435_s1 = inlined_call_operand.vmem [shape: f32[16,4], index: 1, kind: input, shape index: {}]   ;;  %s436_s2 = inlined_call_operand.vmem [shape: f32[16,1], index: 2, kind: input, shape index: {}]   ;;  %s437_s6 = inlined_call_operand.vmem [shape: f32[2,1], index: 6, kind: input, shape index: {}]   ;;  %s438_s3 = inlined_call_operand.vmem [shape: f32[16,16], index: 3, kind: input, shape index: {}]   ;;  %s439_s4 = inlined_call_operand.vmem [shape: f32[16,1], index: 4, kind: input, shape index: {}]   ;;  %s440_s5 = inlined_call_operand.vmem [shape: f32[2,16], index: 5, kind: input, shape index: {}]   ;;  %s441_s7 = inlined_call_operand.vmem [shape: f32[2,128], index: 7, kind: output, shape index: {}]  }
   0x1   :  { %v26_v0 = vld [vmem:[%s434_s0] sm:$0xf]  ;;  %v28_v2 = vld [vmem:[%s435_s1 + $0x8] sm:$0xff]  ;;  %350 = vset.pattern.permute.xlu0 %v352_v3  ;;  %351 = vset.pattern.permute.xlu1 %v352_v3  ;;  %v353_v19 = vmov 0.0   ;;  %vm354_vm3 = vmmov 0  }
   0x2   :  { %v27_v1 = vld [vmem:[%s435_s1] sm:$0xff]  ;;  %328 = vmatprep.subr.msk.mxu0 %vm48_vm0, %v26_v0  ;;  %v30_v4 = vld [vmem:[%s436_s2 + $0x8] sm:$0xff] }
   0x3   :  { %330 = vmatprep.mubr.msk.f32.mxu0 %vm41_vm1, %v27_v1  ;;  %329 = vmatpush3.msk.msra.mxu0 %vm48_vm0, %v26_v0  ;;  %v29_v5 = vld [vmem:[%s436_s2] sm:$0xff]  ;;  %v132_v8 = vld [vmem:[%s439_s4 + $0x8] sm:$0xff] }
   0x4   :  { %38 = vperm.xlu0 %350, %v30_v4   ;;  %331 = vmatmul.mubr.msk.f32.vlgmr.msra.gmra.mxu0 %vm41_vm1, %v28_v2  ;;  %v228_v6 = vld [vmem:[%s437_s6] sm:$0x3]  ;;  %v130_v18 = vld [vmem:[%s438_s3 + $0x8] sm:$0xff] }
   0x5   :  { %v129_v7 = vld [vmem:[%s438_s3] sm:$0xff]  ;;  %140 = vperm.xlu1 %351, %v132_v8   ;;  %340 = vmatprep.subr.mxu0 %v353_v19 }
   0x6   :  { %337 = vmatprep.mubr.msk.f32.mxu1 %vm143_vm2, %v129_v7  ;;  %v131_v9 = vld [vmem:[%s439_s4] sm:$0xff]  ;;  %344 = vmatprep.mubr.msk.f32.mxu0 %vm354_vm3, %v353_v19 }
   0x7   :  { %v227_v28 = vld [vmem:[%s440_s5] sm:$0x3] }
   0x8   :  { %33 = vperm.xlu0 %350, %v29_v5  }
   0x9   :  { %135 = vperm.xlu1 %351, %v131_v9  }
   0xc   :  { %231 = vperm.xlu0 %350, %v228_v6  }
  0x7f   :  { %v39_v10 = vpop.permute.xlu0 %38 }
  0x80   :  { %v141_v20 = vpop.permute.xlu1 %140 }
  0x83   :  { %v34_v13 = vpop.permute.xlu0 %33 }
  0x84   :  { %v136_v23 = vpop.permute.xlu1 %135 }
  0x87   :  { %v232_v29 = vpop.permute.xlu0 %231 }
  0xc4   :  { %v332_v11 = vpop.f32.mrf.mxu0 }
  0xc5   :  { %v124_v12 = vadd.f32 %v332_v11, %v39_v10 }
  0xc6   :  { %v118_v14 = vpop.f32.mrf.mxu0 }
  0xc7   :  { %v128_v15 = vmax.f32 %v124_v12, 0.0  ;;  %v119_v16 = vadd.f32 %v118_v14, %v34_v13 }
  0xc9   :  { %v127_v17 = vmax.f32 %v119_v16, 0.0  ;;  %333 = vmatprep.subr.mxu1 %v128_v15 }
  0xca   :  { %334 = vmatpush3.msra.mxu1 %v128_v15 }
  0xcb   :  { %335 = vmatprep.subr.mxu1 %v127_v17 }
  0xcc   :  { %336 = vmatpush3.msra.mxu1 %v127_v17 }
  0xcd   :  { %338 = vmatmul.mubr.msk.f32.vlgmr.msra.gmra.mxu1 %vm143_vm2, %v130_v18 }
 0x18d   :  { %v339_v21 = vpop.f32.mrf.mxu1 }
 0x18e   :  { %v222_v22 = vadd.f32 %v339_v21, %v141_v20 }
 0x18f   :  { %v216_v24 = vpop.f32.mrf.mxu1 }
 0x190   :  { %v226_v25 = vmax.f32 %v222_v22, 0.0  ;;  %v217_v26 = vadd.f32 %v216_v24, %v136_v23 }
 0x192   :  { %v225_v27 = vmax.f32 %v217_v26, 0.0  ;;  %341 = vmatpush3.msra.mxu0 %v226_v25 }
 0x193   :  { %342 = vmatprep.subr.mxu0 %v353_v19 }
 0x194   :  { %343 = vmatpush3.msra.mxu0 %v225_v27 }
 0x195   :  { %345 = vmatmul.mubr.msk.f32.vlgmr.msra.gmra.mxu0 %vm143_vm2, %v227_v28 }
 0x255   :  { %v303_v30 = vpop.f32.mrf.mxu0 }
 0x256   :  { %v304_v31 = vadd.f32 %v303_v30, %v232_v29 }
 0x257   :  { %v346_v32 = vpop.f32.mrf.mxu0 }
 0x258   :  { %307 = vst [vmem:[%s441_s7] sm:$0x3] %v304_v31 }

</bundles_post_ra>
